<compile_context>
chip_gen: v7x
topology: tpu7x:2x2x1
jax: 0.10.0
libtpu: 0.0.40
codegen_flags: <defaults>
</compile_context>

<pallas_src>
import math

import jax
import jax.numpy as jnp
from jax import lax
from jax.experimental import pallas as pl
from jax.experimental.pallas import tpu as pltpu


def _pick_tb(batch, length):
    """Batch rows per grid step: >=2 grid steps for small B (megacore), and the
    x block's second-minor dim (TB*L) must be 8-aligned or span the full array."""
    cand = max(1, -(-batch // 2)) if batch <= 8 else 8
    for tb in range(min(cand, batch), 0, -1):
        if (tb * length) % 8 == 0:
            return tb
    return batch                      # full-array block is always legal


def conv_attention_block(x, conv_w, conv_b, wq, bq, wk, bk, wv, bv, wo, bo):
    """x: (B, C, L); conv_w: (C, 1, K); conv_b: (C,); W*: (C, C); b*: (C,)."""
    B, C, L = x.shape
    K = conv_w.shape[-1]
    Lo = L - K + 1
    assert Lo >= 1, "sequence shorter than conv kernel"

    f32 = jnp.float32
    bf16 = jnp.bfloat16
    scale = 1.0 / math.sqrt(C)        # d_k = amp_dim = num_channels

    # Channels-last, batch-flattened activations (XLA-side transpose is cheap).
    x2 = jnp.transpose(x, (0, 2, 1)).reshape(B * L, C).astype(f32)

    # Lane-dense (K, C) conv taps and (1, C) biases.
    wc = jnp.transpose(conv_w.reshape(C, K)).astype(f32)          # (K, C)
    bc = conv_b.reshape(1, C).astype(f32)

    # Fused QKV weight (pre-transposed, bf16); fold 1/sqrt(C) into the Q slice.
    wqkv = jnp.concatenate([wq.T * scale, wk.T, wv.T], axis=1).astype(bf16)   # (C, 3C)
    bqkv = jnp.concatenate([bq * scale, bk, bv]).reshape(1, 3 * C).astype(f32)
    wot = wo.T.astype(bf16)                                       # (C, C)
    bo2 = bo.reshape(1, C).astype(f32)

    TB = _pick_tb(B, L)
    G = pl.cdiv(B, TB)
    N = TB * L - (K - 1)              # conv-output rows per tile (incl. K-1
                                      # cross-batch junk rows per batch, never read)
    unroll = min(2, TB)

    def kernel(x_ref, wc_ref, bc_ref, wqkv_ref, bqkv_ref, wot_ref, bo_ref,
               o_ref, qkv_ref, a_ref):
        xt = x_ref[...]                                   # (TB*L, C) f32
        wck = wc_ref[...]                                 # (K, C)   f32

        # Depthwise Conv1d, hoisted over the whole batch tile: K shifted MACs
        # with lane-dense (1, C) taps (VPU only, no transposes).
        acc = xt[0:N, :] * wck[0:1, :]
        for kk in range(1, K):
            acc = acc + xt[kk:kk + N, :] * wck[kk:kk + 1, :]
        t = acc + bc_ref[...]                             # (N, C); rows b*L+t, t<Lo valid

        # One fused QKV matmul for the whole tile: bf16 in, f32 accumulate.
        qkv_ref[...] = jnp.dot(t.astype(bf16), wqkv_ref[...],
                               preferred_element_type=f32) + bqkv_ref[...]

        inv_lo = 1.0 / Lo

        def attend(b, carry):
            off = b * L
            if L % 8 == 0:
                off = pl.multiple_of(off, 8)
            blk = qkv_ref[pl.ds(off, Lo), :]              # (Lo, 3C) this batch's q|k|v
            qb = blk[:, 0:C].astype(bf16)                 # already scaled by 1/sqrt(C)
            kb = blk[:, C:2 * C].astype(bf16)
            vb = blk[:, 2 * C:3 * C].astype(bf16)
            # scores: q @ k^T (contract the lane dim of both -> no transpose).
            s = jax.nn.sigmoid(lax.dot_general(
                qb, kb, (((1,), (1,)), ((), ())),
                preferred_element_type=f32))              # (Lo, Lo)
            # AdaptiveAvgPool1d(1) is linear: pool the scores over queries first,
            # then one (1,Lo)@(Lo,C) matvec replaces the full s@v matmul.
            sbar = jnp.sum(s, axis=0, keepdims=True) * inv_lo        # (1, Lo)
            a_ref[pl.ds(b, 1), :] = jnp.dot(sbar.astype(bf16), vb,
                                            preferred_element_type=f32)
            return carry

        lax.fori_loop(0, TB, attend, 0, unroll=unroll)

        # Output projection on the already-pooled rows + ReLU; single full-tile
        # lane-dense store (no per-row masked stores).
        pooled = jnp.dot(a_ref[...].astype(bf16), wot_ref[...],
                         preferred_element_type=f32) + bo_ref[...]   # (TB, C)
        o_ref[0] = jnp.maximum(pooled, 0.0).astype(o_ref.dtype)

    # Grid-invariant weight blocks use constant index_maps (no re-DMA between
    # steps); at these sizes default double-buffering costs ~nothing.
    const2d = lambda r, c: pl.BlockSpec((r, c), lambda i: (0, 0))

    out3 = pl.pallas_call(
        kernel,
        out_shape=jax.ShapeDtypeStruct((G, TB, C), x.dtype),
        grid=(G,),
        in_specs=[
            pl.BlockSpec((TB * L, C), lambda i: (i, 0)),   # x batch tile
            const2d(K, C),                                 # conv taps
            const2d(1, C),                                 # conv bias
            const2d(C, 3 * C),                             # fused Wq|Wk|Wv (bf16)
            const2d(1, 3 * C),                             # fused bias
            const2d(C, C),                                 # Wo^T (bf16)
            const2d(1, C),                                 # bo
        ],
        out_specs=pl.BlockSpec((1, TB, C), lambda i: (i, 0, 0)),
        scratch_shapes=[
            pltpu.VMEM((N, 3 * C), jnp.float32),           # fused qkv for the tile
            pltpu.VMEM((TB, C), jnp.float32),              # pooled attn rows
        ],
        compiler_params=pltpu.CompilerParams(
            dimension_semantics=("parallel",),
            vmem_limit_bytes=32 * 1024 * 1024,
        ),
    )(x2, wc, bc, wqkv, bqkv, wot, bo2)

    out2 = out3.reshape(G * TB, C)[:B]                     # drop padded batch rows
    return out2[:, :, None]                                # (B, C, 1)


def reference_forward(x, conv_w, conv_b, wq, bq, wk, bk, wv, bv, wo, bo):
    """Pure-JAX reference of the PyTorch module (f32, HIGHEST precision)."""
    B, C, L = x.shape
    K = conv_w.shape[-1]
    Lo = L - K + 1
    hi = lax.Precision.HIGHEST
    xf = x.astype(jnp.float32)
    wc = conv_w.reshape(C, K).astype(jnp.float32)

    y = jnp.zeros((B, C, Lo), jnp.float32)
    for kk in range(K):
        y = y + xf[:, :, kk:kk + Lo] * wc[:, kk][None, :, None]
    y = y + conv_b.astype(jnp.float32)[None, :, None]

    t = jnp.transpose(y, (0, 2, 1))                        # (B, Lo, C)
    q = jnp.einsum('blc,dc->bld', t, wq, precision=hi) + bq
    k = jnp.einsum('blc,dc->bld', t, wk, precision=hi) + bk
    v = jnp.einsum('blc,dc->bld', t, wv, precision=hi) + bv
    s = jax.nn.sigmoid(
        jnp.einsum('bld,bmd->blm', q, k, precision=hi) / math.sqrt(C))
    attn = jnp.einsum('blm,bmd->bld', s, v, precision=hi)
    out = jnp.einsum('bld,cd->blc', attn, wo, precision=hi) + bo
    pooled = jnp.mean(out, axis=1)                         # (B, C)
    return jax.nn.relu(pooled)[:, :, None].astype(x.dtype)


if __name__ == "__main__":
    B, C, L, K = 2, 4, 16, 3            # batch, num_channels, seq, conv kernel

    key = jax.random.PRNGKey(0)
    keys = jax.random.split(key, 11)

    x = jax.random.normal(keys[0], (B, C, L), dtype=jnp.float32)

    # Conv1d(groups=C): weight (C, 1, K); fan_in = 1 * K.
    cb = 1.0 / math.sqrt(K)
    conv_w = jax.random.uniform(keys[1], (C, 1, K), jnp.float32, -cb, cb)
    conv_b = jax.random.uniform(keys[2], (C,), jnp.float32, -cb, cb)

    # SelfAttentionlayer Linear layers: (C, C) weights, fan_in = C.
    lb = 1.0 / math.sqrt(C)
    wq = jax.random.uniform(keys[3], (C, C), jnp.float32, -lb, lb)
    bq = jax.random.uniform(keys[4], (C,), jnp.float32, -lb, lb)
    wk = jax.random.uniform(keys[5], (C, C), jnp.float32, -lb, lb)
    bk = jax.random.uniform(keys[6], (C,), jnp.float32, -lb, lb)
    wv = jax.random.uniform(keys[7], (C, C), jnp.float32, -lb, lb)
    bv = jax.random.uniform(keys[8], (C,), jnp.float32, -lb, lb)
    wo = jax.random.uniform(keys[9], (C, C), jnp.float32, -lb, lb)
    bo = jax.random.uniform(keys[10], (C,), jnp.float32, -lb, lb)

    out = conv_attention_block(x, conv_w, conv_b, wq, bq, wk, bk, wv, bv, wo, bo)
    out = jax.block_until_ready(out)

    ref = reference_forward(x, conv_w, conv_b, wq, bq, wk, bk, wv, bv, wo, bo)
    assert out.shape == (B, C, 1), out.shape
    # Kernel matmuls use bf16 operands with f32 accumulation (single-pass MXU),
    # so compare against the f32/HIGHEST reference at bf16-level tolerance.
    assert jnp.allclose(out, ref, atol=2e-2, rtol=2e-2), "mismatch vs reference"

    print("KERNEL_OK")
</pallas_src>

<mosaic_0001>
module attributes {stable_mosaic.version = 11 : i64} {
  func.func @kernel(%arg0: i32, %arg1: memref<16x4xf32, #tpu.memory_space<vmem>>, %arg2: memref<3x4xf32, #tpu.memory_space<vmem>>, %arg3: memref<1x4xf32, #tpu.memory_space<vmem>>, %arg4: memref<4x12xbf16, #tpu.memory_space<vmem>>, %arg5: memref<1x12xf32, #tpu.memory_space<vmem>>, %arg6: memref<4x4xbf16, #tpu.memory_space<vmem>>, %arg7: memref<1x4xf32, #tpu.memory_space<vmem>>, %arg8: memref<1x1x4xf32, #tpu.memory_space<vmem>>, %arg9: memref<14x12xf32, #tpu.memory_space<vmem>>, %arg10: memref<1x4xf32, #tpu.memory_space<vmem>>) attributes {dimension_semantics = [#tpu.dimension_semantics<parallel>], iteration_bounds = array<i64: 2>, scalar_prefetch = 0 : i64, scratch_operands = 2 : i64, tpu.core_type = #tpu.core_type<tc>, window_params = [{transform_indices = @transform_0, window_bounds = array<i64: 16, 4>}, {pipeline_mode = #tpu.pipeline_mode<synchronous>, transform_indices = @transform_1, window_bounds = array<i64: 3, 4>}, {pipeline_mode = #tpu.pipeline_mode<synchronous>, transform_indices = @transform_2, window_bounds = array<i64: 1, 4>}, {pipeline_mode = #tpu.pipeline_mode<synchronous>, transform_indices = @transform_3, window_bounds = array<i64: 4, 12>}, {pipeline_mode = #tpu.pipeline_mode<synchronous>, transform_indices = @transform_4, window_bounds = array<i64: 1, 12>}, {pipeline_mode = #tpu.pipeline_mode<synchronous>, transform_indices = @transform_5, window_bounds = array<i64: 4, 4>}, {pipeline_mode = #tpu.pipeline_mode<synchronous>, transform_indices = @transform_6, window_bounds = array<i64: 1, 4>}, {transform_indices = @transform_7, window_bounds = array<i64: 1, 1, 4>}]} {
    %c0 = arith.constant 0 : index
    %c0_0 = arith.constant 0 : index
    %0 = vector.load %arg1[%c0, %c0_0] : memref<16x4xf32, #tpu.memory_space<vmem>>, vector<16x4xf32>
    %c0_1 = arith.constant 0 : index
    %c0_2 = arith.constant 0 : index
    %1 = vector.load %arg2[%c0_1, %c0_2] : memref<3x4xf32, #tpu.memory_space<vmem>>, vector<3x4xf32>
    %2 = vector.extract_strided_slice %0 {offsets = [0, 0], sizes = [14, 4], strides = [1, 1]} : vector<16x4xf32> to vector<14x4xf32>
    %3 = vector.extract_strided_slice %1 {offsets = [0, 0], sizes = [1, 4], strides = [1, 1]} : vector<3x4xf32> to vector<1x4xf32>
    %4 = vector.broadcast %3 : vector<1x4xf32> to vector<14x4xf32>
    %5 = arith.mulf %2, %4 : vector<14x4xf32>
    %6 = vector.extract_strided_slice %0 {offsets = [1, 0], sizes = [14, 4], strides = [1, 1]} : vector<16x4xf32> to vector<14x4xf32>
    %7 = vector.extract_strided_slice %1 {offsets = [1, 0], sizes = [1, 4], strides = [1, 1]} : vector<3x4xf32> to vector<1x4xf32>
    %8 = vector.broadcast %7 : vector<1x4xf32> to vector<14x4xf32>
    %9 = arith.mulf %6, %8 : vector<14x4xf32>
    %10 = arith.addf %5, %9 : vector<14x4xf32>
    %11 = vector.extract_strided_slice %0 {offsets = [2, 0], sizes = [14, 4], strides = [1, 1]} : vector<16x4xf32> to vector<14x4xf32>
    %12 = vector.extract_strided_slice %1 {offsets = [2, 0], sizes = [1, 4], strides = [1, 1]} : vector<3x4xf32> to vector<1x4xf32>
    %13 = vector.broadcast %12 : vector<1x4xf32> to vector<14x4xf32>
    %14 = arith.mulf %11, %13 : vector<14x4xf32>
    %15 = arith.addf %10, %14 : vector<14x4xf32>
    %c0_3 = arith.constant 0 : index
    %c0_4 = arith.constant 0 : index
    %16 = vector.load %arg3[%c0_3, %c0_4] : memref<1x4xf32, #tpu.memory_space<vmem>>, vector<1x4xf32>
    %17 = vector.broadcast %16 : vector<1x4xf32> to vector<14x4xf32>
    %18 = arith.addf %15, %17 : vector<14x4xf32>
    %19 = arith.truncf %18 : vector<14x4xf32> to vector<14x4xbf16>
    %c0_5 = arith.constant 0 : index
    %c0_6 = arith.constant 0 : index
    %20 = vector.load %arg4[%c0_5, %c0_6] : memref<4x12xbf16, #tpu.memory_space<vmem>>, vector<4x12xbf16>
    %cst = arith.constant dense<0.000000e+00> : vector<14x12xf32>
    %21 = tpu.matmul %19, %20, %cst {dimension_numbers = #tpu.dot_dimension_numbers<[1], [0], [0], [1], [0, 0, 1, 1], [], []>} : vector<14x4xbf16>, vector<4x12xbf16>, vector<14x12xf32> -> vector<14x12xf32>
    %c0_7 = arith.constant 0 : index
    %c0_8 = arith.constant 0 : index
    %22 = vector.load %arg5[%c0_7, %c0_8] : memref<1x12xf32, #tpu.memory_space<vmem>>, vector<1x12xf32>
    %23 = vector.broadcast %22 : vector<1x12xf32> to vector<14x12xf32>
    %24 = arith.addf %21, %23 : vector<14x12xf32>
    %c0_9 = arith.constant 0 : index
    %c0_10 = arith.constant 0 : index
    %25 = vector.load %arg9[%c0_9, %c0_10] : memref<14x12xf32, #tpu.memory_space<vmem>>, vector<14x12xf32>
    tpu.vector_store %arg9[%c0_9, %c0_10], %24 {strides = array<i32>} : memref<14x12xf32, #tpu.memory_space<vmem>>, vector<14x12xf32>,
    %c0_i32 = arith.constant 0 : i32
    %c16_i32 = arith.constant 16 : i32
    %26 = arith.muli %c0_i32, %c16_i32 : i32
    %27 = tpu.assume_multiple %26, 8 : i32
    %28 = arith.index_cast %27 : i32 to index
    %c0_11 = arith.constant 0 : index
    %29 = vector.load %arg9[%28, %c0_11] : memref<14x12xf32, #tpu.memory_space<vmem>>, vector<14x12xf32>
    %30 = vector.extract_strided_slice %29 {offsets = [0, 0], sizes = [14, 4], strides = [1, 1]} : vector<14x12xf32> to vector<14x4xf32>
    %31 = arith.truncf %30 : vector<14x4xf32> to vector<14x4xbf16>
    %32 = vector.extract_strided_slice %29 {offsets = [0, 4], sizes = [14, 4], strides = [1, 1]} : vector<14x12xf32> to vector<14x4xf32>
    %33 = arith.truncf %32 : vector<14x4xf32> to vector<14x4xbf16>
    %34 = vector.extract_strided_slice %29 {offsets = [0, 8], sizes = [14, 4], strides = [1, 1]} : vector<14x12xf32> to vector<14x4xf32>
    %35 = arith.truncf %34 : vector<14x4xf32> to vector<14x4xbf16>
    %cst_12 = arith.constant dense<0.000000e+00> : vector<14x14xf32>
    %36 = tpu.matmul %31, %33, %cst_12 {dimension_numbers = #tpu.dot_dimension_numbers<[1], [1], [0], [0], [0, 0, 1, 0], [], []>} : vector<14x4xbf16>, vector<14x4xbf16>, vector<14x14xf32> -> vector<14x14xf32>
    %37 = arith.negf %36 : vector<14x14xf32>
    %38 = math.exp %37 : vector<14x14xf32>
    %cst_13 = arith.constant 1.000000e+00 : f32
    %39 = vector.broadcast %cst_13 : f32 to vector<14x14xf32>
    %40 = arith.addf %39, %38 : vector<14x14xf32>
    %41 = arith.divf %39, %40 : vector<14x14xf32>
    %cst_14 = arith.constant dense<0.000000e+00> : vector<14xf32>
    %42 = vector.multi_reduction <add>, %41, %cst_14 [0] : vector<14x14xf32> to vector<14xf32>
    %43 = vector.shape_cast %42 : vector<14xf32> to vector<1x14xf32>
    %cst_15 = arith.constant 0.0714285746 : f32
    %44 = vector.broadcast %cst_15 : f32 to vector<1x14xf32>
    %45 = arith.mulf %43, %44 : vector<1x14xf32>
    %46 = arith.truncf %45 : vector<1x14xf32> to vector<1x14xbf16>
    %cst_16 = arith.constant dense<0.000000e+00> : vector<1x4xf32>
    %47 = tpu.matmul %46, %35, %cst_16 {dimension_numbers = #tpu.dot_dimension_numbers<[1], [0], [0], [1], [0, 0, 1, 1], [], []>} : vector<1x14xbf16>, vector<14x4xbf16>, vector<1x4xf32> -> vector<1x4xf32>
    %48 = arith.index_cast %c0_i32 : i32 to index
    %c0_17 = arith.constant 0 : index
    %49 = vector.load %arg10[%48, %c0_17] : memref<1x4xf32, #tpu.memory_space<vmem>>, vector<1x4xf32>
    tpu.vector_store %arg10[%48, %c0_17], %47 {strides = array<i32>} : memref<1x4xf32, #tpu.memory_space<vmem>>, vector<1x4xf32>,
    %c1_i32 = arith.constant 1 : i32
    %c0_18 = arith.constant 0 : index
    %c0_19 = arith.constant 0 : index
    %50 = vector.load %arg10[%c0_18, %c0_19] : memref<1x4xf32, #tpu.memory_space<vmem>>, vector<1x4xf32>
    %51 = arith.truncf %50 : vector<1x4xf32> to vector<1x4xbf16>
    %c0_20 = arith.constant 0 : index
    %c0_21 = arith.constant 0 : index
    %52 = vector.load %arg6[%c0_20, %c0_21] : memref<4x4xbf16, #tpu.memory_space<vmem>>, vector<4x4xbf16>
    %cst_22 = arith.constant dense<0.000000e+00> : vector<1x4xf32>
    %53 = tpu.matmul %51, %52, %cst_22 {dimension_numbers = #tpu.dot_dimension_numbers<[1], [0], [0], [1], [0, 0, 1, 1], [], []>} : vector<1x4xbf16>, vector<4x4xbf16>, vector<1x4xf32> -> vector<1x4xf32>
    %c0_23 = arith.constant 0 : index
    %c0_24 = arith.constant 0 : index
    %54 = vector.load %arg7[%c0_23, %c0_24] : memref<1x4xf32, #tpu.memory_space<vmem>>, vector<1x4xf32>
    %55 = arith.addf %53, %54 : vector<1x4xf32>
    %cst_25 = arith.constant 0.000000e+00 : f32
    %56 = vector.broadcast %cst_25 : f32 to vector<1x4xf32>
    %57 = arith.maximumf %55, %56 : vector<1x4xf32>
    %c0_26 = arith.constant 0 : index
    %c0_27 = arith.constant 0 : index
    %c0_28 = arith.constant 0 : index
    %58 = vector.load %arg8[%c0_26, %c0_27, %c0_28] : memref<1x1x4xf32, #tpu.memory_space<vmem>>, vector<1x1x4xf32>
    %59 = vector.shape_cast %58 : vector<1x1x4xf32> to vector<1x4xf32>
    %60 = vector.shape_cast %57 : vector<1x4xf32> to vector<1x1x4xf32>
    tpu.vector_store %arg8[%c0_26, %c0_27, %c0_28], %60 {strides = array<i32>} : memref<1x1x4xf32, #tpu.memory_space<vmem>>, vector<1x1x4xf32>,
    return
  }
  func.func @transform_0(%arg0: i32) -> (i32, i32) {
    %c0_i32 = arith.constant 0 : i32
    %c0_i32_0 = arith.constant 0 : i32
    return %arg0, %c0_i32 : i32, i32
  }
  func.func @transform_1(%arg0: i32) -> (i32, i32) {
    %c0_i32 = arith.constant 0 : i32
    %c0_i32_0 = arith.constant 0 : i32
    %c0_i32_1 = arith.constant 0 : i32
    return %c0_i32, %c0_i32_0 : i32, i32
  }
  func.func @transform_2(%arg0: i32) -> (i32, i32) {
    %c0_i32 = arith.constant 0 : i32
    %c0_i32_0 = arith.constant 0 : i32
    %c0_i32_1 = arith.constant 0 : i32
    return %c0_i32, %c0_i32_0 : i32, i32
  }
  func.func @transform_3(%arg0: i32) -> (i32, i32) {
    %c0_i32 = arith.constant 0 : i32
    %c0_i32_0 = arith.constant 0 : i32
    %c0_i32_1 = arith.constant 0 : i32
    return %c0_i32, %c0_i32_0 : i32, i32
  }
  func.func @transform_4(%arg0: i32) -> (i32, i32) {
    %c0_i32 = arith.constant 0 : i32
    %c0_i32_0 = arith.constant 0 : i32
    %c0_i32_1 = arith.constant 0 : i32
    return %c0_i32, %c0_i32_0 : i32, i32
  }
  func.func @transform_5(%arg0: i32) -> (i32, i32) {
    %c0_i32 = arith.constant 0 : i32
    %c0_i32_0 = arith.constant 0 : i32
    %c0_i32_1 = arith.constant 0 : i32
    return %c0_i32, %c0_i32_0 : i32, i32
  }
  func.func @transform_6(%arg0: i32) -> (i32, i32) {
    %c0_i32 = arith.constant 0 : i32
    %c0_i32_0 = arith.constant 0 : i32
    %c0_i32_1 = arith.constant 0 : i32
    return %c0_i32, %c0_i32_0 : i32, i32
  }
  func.func @transform_7(%arg0: i32) -> (i32, i32, i32) {
    %c0_i32 = arith.constant 0 : i32
    %c0_i32_0 = arith.constant 0 : i32
    %c0_i32_1 = arith.constant 0 : i32
    return %arg0, %c0_i32, %c0_i32_0 : i32, i32, i32
  }
}

</mosaic_0001>

<bundles_post_ra>
// kernel: tpu_custom_call.1
= control target key start
LH: loop header
LB: loop body
LE: loop exit
PB: predicated region body
PF: predicated region fallthrough
CT: control target
= control target key end

     0   :  { %12 = vsyncpa [#allocation5], 0  ;;  %s987_s0 = inlined_call_operand.vmem [shape: f32[32,4], index: 0, kind: input, shape index: {}]   ;;  %s988_s1 = inlined_call_operand.vmem [shape: f32[3,4], index: 1, kind: input, shape index: {}]   ;;  %s989_s2 = inlined_call_operand.vmem [shape: f32[1,4], index: 2, kind: input, shape index: {}]   ;;  %s990_s3 = inlined_call_operand.vmem [shape: bf16[4,12], index: 3, kind: input, shape index: {}]   ;;  %s991_s4 = inlined_call_operand.vmem [shape: f32[1,12], index: 4, kind: input, shape index: {}]   ;;  %s992_s5 = inlined_call_operand.vmem [shape: bf16[4,4], index: 5, kind: input, shape index: {}]   ;;  %s993_s6 = inlined_call_operand.vmem [shape: f32[1,4], index: 6, kind: input, shape index: {}]   ;;  %s994_s7 = inlined_call_operand.hbm [shape: f32[2,1,4], index: 7, kind: output, shape index: {}]  }
   0x1   :  { %14 = vsyncpa [#allocation5 + $0x1], 0  ;;  %s848_s24 = smov 0   ;;  %s850_s25 = smov 0  }
   0x2   :  { %s852_s26 = smov 0   ;;  %s854_s27 = smov 0  }
   0x3 LB: > { %s869_s28 = sadd.s32 4294967295, %s801_s27   ;;  %s639_s29 = sadd.s32 4294967294, %s801_s27   ;;  %s801_s27 = sphi %s854_s27, %s1000_s27   ;;  %s797_s26 = sphi %s852_s26, %s999_s26   ;;  %s793_s25 = sphi %s850_s25, %s998_s25   ;;  %s789_s24 = sphi %s848_s24, %s997_s24  }
   0x4   : > { %s873_s30 = sadd.s32 1, %s801_s27   ;;  %s179_s8 = sadd.s32 1, %s797_s26 }
   0x5   : > { %s176_s9 = ssub.s32 %s801_s27, %s873_s30  ;;  %p189_p0 = scmp.ne.s32.totalorder %s797_s26, %s793_s25 }
   0x6   : > { %p177_p1 = scmp.eq.s32.totalorder %s176_s9, 0  ;;  %p190_p2 = scmp.eq.s32.totalorder %s869_s28, 1 }
   0x7   : > { %p195_p3 = scmp.ne.s32.totalorder %s793_s25, %s789_s24  ;;  %p196_p4 = scmp.eq.s32.totalorder %s639_s29, 1 }
   0x8   : > { %s884_s10 = scalar_select %p177_p1, %s797_s26, %s179_s8  }
   0x9   : > { %p886_p5 = por %p190_p2, %p189_p0  ;;  %p890_p6 = por %p196_p4, %p195_p3 }
   0xa   : > { %p642_p7 = scmp.ge.s32.totalorder %s801_s27, 1  ;;  %p241_p8 = scmp.lt.s32.totalorder %s801_s27, 3 }
   0xc   : > { %p242_p9 = pnand %p642_p7, %p241_p8 }
   0xd   : > { %v330_v0 = vld [vmem:[%s990_s3] sm:$0x3] (!%p242_p9)  ;;  %vm342_vm0 = vcmask (!%p242_p9), 1041408   ;;  %v282_v1 = vlaneseq (!%p242_p9)  ;;  %v803_v2 = vmov (!%p242_p9), 0.0   ;;  %s643_s15 = sshll.u32 (!%p242_p9), %s869_s28, 1  ;;  %vm804_vm1 = vmmov (!%p242_p9), 0  }
   0xe   : > { %245 = sbr.rel (%p242_p9) target bundleno = 1098 (0x44a), region = 48  ;;  %664 = vmatprep.subr.bf16.mxu0 (!%p242_p9), %v803_v2  ;;  %v344_v3 = vsel (!%p242_p9), %vm342_vm0, %v330_v0, 0  ;;  %670 = vmatprep.subr.bf16.mxu1 (!%p242_p9), %v803_v2  ;;  %p273_p10 = scmp.lt.s32.totalorder (!%p242_p9), %s643_s15, 3  ;;  %v281_v5 = vld [vmem:[%s988_s1] sm:$0x7] (!%p242_p9)  ;;  %vm296_vm2 = vcmask (!%p242_p9), 1046528  }
   0xf   : > { %665 = vmatpush3.bf16.msra.mxu0 (!%p242_p9), %v344_v3  ;;  %666 = vmatprep.mubr.msk.bf16.mxu0 (!%p242_p9), %vm804_vm1, %v803_v2  ;;  %v283_v4 = vshrl.u32 (!%p242_p9), %v282_v1, 7  ;;  %vm312_vm3 = vcmask (!%p242_p9), 1045504   ;;  %v645_v28 = vld [vmem:[%s989_s2] ss:$0 sm:$0xff] (!%p242_p9)  ;;  %vm338_vm4 = vcmask (!%p242_p9), 31744   ;;  %vm387_vm5 = vcmask (!%p242_p9), 97280  }
  0x10   : > { %676 = vmatprep.subr.bf16.mxu0 (!%p242_p9), %v803_v2  ;;  %672 = vmatprep.mubr.msk.bf16.mxu1 (!%p242_p9), %vm804_vm1, %v803_v2  ;;  %v646_v34 = vld [vmem:[%s991_s4] ss:$0 sm:$0xff] (!%p242_p9)  ;;  %vm389_vm6 = vcmask (!%p242_p9), 95232   ;;  %s805_s9 = smov (!%p242_p9), 124   ;;  %s806_s13 = smov (!%p242_p9), 120   ;;  %vm456_vm7 = vcmask (!%p242_p9), 113664  }
  0x11   : > { %v284_v6 = vsub.s32 (!%p242_p9), 0, %v283_v4  ;;  %v290_v7 = vsub.s32 (!%p242_p9), 1, %v283_v4  ;;  %v306_v8 = vsub.s32 (!%p242_p9), 2, %v283_v4  ;;  %v521_v46 = vld [vmem:[%s992_s5] sm:$0x3] (!%p242_p9)  ;;  %vm458_vm8 = vcmask (!%p242_p9), 111616  }
  0x12   : > { %v527_v49 = vsel (!%p242_p9), %vm342_vm0, %v521_v46, 0  ;;  %vm517_vm9 = vcmask (!%p242_p9), 24576   ;;  %s270_s16 = sand.u32 (!%p242_p9), 1, %s793_s25   ;;  %s653_s19 = sshll.u32 (!%p242_p9), %s869_s28, 4 }
  0x13   : > { %v285_v9 = vrot.slane (!%p242_p9), %v281_v5, %v284_v6  ;;  %v291_v10 = vrot.slane (!%p242_p9), %v281_v5, %v290_v7  ;;  %v307_v11 = vrot.slane (!%p242_p9), %v281_v5, %v306_v8  ;;  %s271_s20 = scalar_lea.vmem (!%p242_p9), [#allocation4], %s270_s16  ;;  %s944_s29 = scalar_lea.hbm (!%p242_p9), %s994_s7, %s653_s19 }
  0x14   : > { %s572_s28 = scalar_lea.sflag (!%p242_p9), [#allocation5], %s270_s16 }
  0x15   : > { %s1002_s15 = smov (!%p273_p10, %s643_s15), 3 }
  0x16   : > { %s644_s18 = sshll.u32 %s1002_s15, 3 }
  0x17   : > { %s276_s21 = scalar_lea.vmem %s987_s0, %s644_s18 }
  0x18   : > { %v279_v12 = vld [vmem:[%s276_s21] sm:$0xff]  ;;  %v280_v13 = vld [vmem:[%s276_s21 + $0x8] sm:$0xff]  ;;  %s584_s21 = sshll.u32 %s271_s20, 4  ;;  %s946_s21 = int_to_ptr.vmem [resolvable:$true] %s584_s21 }
  0x19   : > { %v287_v14 = vmul.f32 %v285_v9, %v280_v13  ;;  %v292_v15 = vmul.f32 %v291_v10, %v279_v12  ;;  %v293_v16 = vmul.f32 %v291_v10, %v280_v13  ;;  %v286_v17 = vmul.f32 %v285_v9, %v279_v12  ;;  %s739_s8 = scalar_lea.vmem %s946_s21, 16 }
  0x1a   : > { %v308_v18 = vmul.f32 %v307_v11, %v279_v12  ;;  %v309_v19 = vmul.f32 %v307_v11, %v280_v13  ;;  %p740_p11 = scmp.ne.s32.totalorder %s946_s21, %s739_s8 }
  0x1b   : > { %v297_v20 = vrot.slane %v292_v15, 1  ;;  %v298_v21 = vrot.slane %v293_v16, 1  ;;  %v522_v15 = vld [vmem:[%s993_s6] sm:$0x1] }
  0x1c   : > { %v313_v22 = vrot.slane %v308_v18, 2  ;;  %v314_v23 = vrot.slane %v309_v19, 2  ;;  %p741_p12 = pnand %p740_p11, %p886_p5 }
  0x1d   : > { %v299_v24 = vsel %vm296_vm2, %v297_v20, %v298_v21  ;;  %v303_v25 = vadd.f32 %v298_v21, %v287_v14 }
  0x1e   : > { %v302_v26 = vadd.f32 %v299_v24, %v286_v17  ;;  %v315_v27 = vsel %vm312_vm3, %v313_v22, %v314_v23  ;;  %p742_p13 = pneg %p741_p12 }
  0x1f   : > { %v319_v29 = vadd.f32 %v314_v23, %v303_v25 }
  0x20   : > { %v318_v30 = vadd.f32 %v315_v27, %v302_v26 }
  0x21   : > { %v328_v31 = vadd.f32 %v645_v28, %v319_v29 }
  0x22   : > { %v327_v32 = vadd.f32 %v645_v28, %v318_v30 }
  0x24   : > { %v329_v33 = vpack.c.bf16 %v328_v31, %v327_v32 }
  0x26   : > { %667 = vmatmul.mubr.msk.bf16.vlgmr.msra.gmra.mrb[0].mxu0 %vm338_vm4, %v329_v33 }
  0x27   : > { %678 = vmatprep.mubr.msk.bf16.mxu0 %vm804_vm1, %v803_v2 }
  0xf9   : > { %v380_v35 = vpop.f32.mrb[0].mxu0 }
  0xfa   : > { %v381_v36 = vadd.f32 %v646_v34, %v380_v35  ;;  %v668_v37 = vpop.f32.mrb[1].mxu0 }
  0xfb   : > { %v383_v38 = vpop.f32.mrb[2].mxu0 }
  0xfc   : > { %388 = vst.msk [vmem:[#allocation2] sm:$0xff] %vm387_vm5, %v381_v36  ;;  %v384_v39 = vadd.f32 %v646_v34, %v383_v38  ;;  %v669_v40 = vpop.f32.mrb[3].mxu0 }
  0xfe   : > { %390 = vst.msk [vmem:[#allocation2 + $0x8] sm:$0x3f] %vm389_vm6, %v384_v39 }
 0x103   : > { %v391_v41 = vld [vmem:[#allocation2] sm:$0xff] }
 0x105   : > { %v392_v42 = vld [vmem:[#allocation2 + $0x8] sm:$0x3f] }
 0x106   : > { %v393_v43 = vpack.c.bf16 %v392_v42, %v391_v41 }
 0x108   : > { %395 = vrot.lane.b32.xlu0 %v393_v43, %s805_s9  ;;  %s807_s9 = smov [#allocation4]  }
 0x10c   : > { %469 = vrot.lane.b32.xlu0 %v393_v43, %s806_s13  ;;  %s743_s13 = sshll.u32 %s807_s9, 4  ;;  %s744_s13 = int_to_ptr.vmem [resolvable:$false] %s743_s13 }
 0x10d   : > { %s745_s14 = scalar_lea.vmem %s744_s13, 32  ;;  %p746_p0 = scmp.lt.s32.totalorder %s946_s21, %s744_s13 }
 0x10e   : > { %p747_p1 = scmp.lt.s32.totalorder %s745_s14, %s739_s8 }
 0x110   : > { %p748_p2 = por %p747_p1, %p746_p0 }
 0x112   : > { %p749_p3 = pnand %p748_p2, %p742_p13 }
 0x17a   : > { %v396_v44 = vpop.permute.xlu0 %395 }
 0x17b   : > { %v401_v45 = vsel %vm338_vm4, %v396_v44, 0 }
 0x17c   : > { %671 = vmatpush3.bf16.xpose.msra.mxu1 %v401_v45 }
 0x17d   : > { %682 = vmatprep.subr.bf16.mxu1 %v803_v2 }
 0x17e   : > { %v470_v47 = vpop.permute.xlu0 %469 }
 0x17f   : > { %v475_v48 = vsel %vm296_vm2, %v470_v47, 0 }
 0x180   : > { %677 = vmatpush3.bf16.msra.mxu0 %v475_v48 }
 0x183   : > { %673 = vmatmul.mubr.msk.bf16.vlgmr.msra.gmra.mrb[0].mxu1 %vm338_vm4, %v393_v43 }
 0x184   : > { %683 = vmatpush3.bf16.msra.mxu1 %v527_v49  ;;  %684 = vmatprep.mubr.msk.bf16.mxu1 %vm804_vm1, %v803_v2 }
 0x256   : > { %v437_v50 = vpop.f32.mrb[0].mxu1 }
 0x257   : > { %v649_v51 = vmul.f32 -1.442695, %v437_v50  ;;  %v674_v52 = vpop.f32.mrb[1].mxu1 }
 0x258   : > { %v440_v53 = vpop.f32.mrb[2].mxu1 }
 0x259   : > { %731 = vpow2.f32 %v649_v51  ;;  %v650_v54 = vmul.f32 -1.442695, %v440_v53  ;;  %v675_v55 = vpop.f32.mrb[3].mxu1 }
 0x25b   : > { %733 = vpow2.f32 %v650_v54 }
 0x263   : > { %v732_v56 = vpop.eup %731 }
 0x264   : > { %v450_v57 = vadd.f32 1.0, %v732_v56 }
 0x265   : > { %v734_v58 = vpop.eup %733 }
 0x266   : > { %735 = vrcp.f32 %v450_v57  ;;  %v451_v59 = vadd.f32 1.0, %v734_v58 }
 0x268   : > { %737 = vrcp.f32 %v451_v59 }
 0x270   : > { %v736_v60 = vpop.eup %735 }
 0x271   : > { %v457_v62 = vsel %vm456_vm7, %v736_v60, 0.0 }
 0x272   : > { %v738_v61 = vpop.eup %737 }
 0x273   : > { %v459_v63 = vsel %vm458_vm8, %v738_v61, 0.0 }
 0x274   : > { %v460_v0 = vadd.f32 %v459_v63, %v457_v62 }
 0x276   : > { %v461_v1 = vrot.slane %v460_v0, 4 }
 0x278   : > { %v462_v2 = vadd.f32 %v461_v1, %v460_v0 }
 0x27a   : > { %v463_v3 = vrot.slane %v462_v2, 2 }
 0x27c   : > { %v464_v4 = vadd.f32 %v463_v3, %v462_v2 }
 0x27e   : > { %v465_v5 = vrot.slane %v464_v4, 1 }
 0x280   : > { %v466_v6 = vadd.f32 %v465_v5, %v464_v4 }
 0x282   : > { %v467_v7 = vmul.f32 0.071428575, %v466_v6 }
 0x284   : > { %v468_v8 = vpack.c.bf16 %v467_v7, %v467_v7 }
 0x286   : > { %679 = vmatmul.mubr.msk.bf16.vlgmr.msra.gmra.mrb[4].mxu0 %vm456_vm7, %v468_v8 }
 0x359   : > { %v511_v9 = vpop.f32.mrb[4].mxu0 }
 0x35a   : > { %518 = vst.msk [vmem:[#allocation3] sm:$0x1] %vm517_vm9, %v511_v9  ;;  %v680_v10 = vpop.f32.mrb[5].mxu0 }
 0x35b   : > { %v514_v11 = vpop.f32.mrb[6].mxu0 }
 0x35c   : > { %v681_v12 = vpop.f32.mrb[7].mxu0 }
 0x361   : > { %v519_v13 = vld [vmem:[#allocation3] sm:$0x1] }
 0x362   : > { %v520_v14 = vpack.c.bf16 %v519_v13, %v519_v13 }
 0x364   : > { %685 = vmatmul.mubr.msk.bf16.vlgmr.msra.gmra.mrb[4].mxu1 %vm338_vm4, %v520_v14 }
 0x437   : > { %v563_v16 = vpop.f32.mrb[4].mxu1 }
 0x438   : > { %v564_v17 = vadd.f32 %v563_v16, %v522_v15  ;;  %v686_v18 = vpop.f32.mrb[5].mxu1 }
 0x439   : > { %v566_v19 = vpop.f32.mrb[6].mxu1 }
 0x43a   : > { %v569_v20 = vmax.f32 %v564_v17, 0.0  ;;  %v687_v21 = vpop.f32.mrb[7].mxu1 }
 0x43c   : > { %570 = vst.msk [vmem:[%s271_s20] sm:$0x1] %vm517_vm9, %v569_v20 }
 0x43d   : > { %752 = shalt.err (!%p749_p3)
}
 0x43e   : > { %s753_s15 = scalar_lea.hbm %s944_s29, 16  ;;  %s757_s18 = scalar_lea.hbm %s994_s7, 32 }
 0x43f   : > { %p754_p4 = scmp.ne.s32.totalorder %s944_s29, %s753_s15  ;;  %p758_p9 = scmp.lt.u32.totalorder %s944_s29, %s994_s7 }
 0x440   : > { %p759_p10 = scmp.lt.u32.totalorder %s757_s18, %s753_s15  ;;  %p761_p12 = scmp.lt.u32.totalorder %s753_s15, %s944_s29 }
 0x441   : > { %p755_p7 = pnand %p754_p4, %p886_p5 }
 0x442   : > { %p760_p11 = por %p759_p10, %p758_p9 }
 0x443   : > { %p756_p8 = pneg %p755_p7 }
 0x444   : > { %p762_p13 = por %p761_p12, %p760_p11 }
 0x446   : > { %p763_p0 = pnand %p762_p13, %p756_p8 }
 0x448   : > { %766 = shalt.err (!%p763_p0)
}
 0x449   : > { %688 = dma.vmem_to_hbm [thread:$0]  (%p886_p5), %s946_s21, 16, %s944_s29, %s572_s28  }
 0x44a PF: > { %p694_p1 = scmp.ge.s32.totalorder %s801_s27, 2  ;;  %s596_s22 = sand.u32 1, %s789_s24  }
 0x44b   : > { %s597_s23 = scalar_lea.sflag [#allocation5], %s596_s22 }
 0x44c   : > { %p691_p2 = pnand %p694_p1, %p890_p6 }
 0x44e   : > { %784 = dma.done.wait (!%p691_p2), %s597_s23, 16  }
 0x44f   : > { %786 = vsyncadd (!%p691_p2), %s597_s23, 4294967280  ;;  %p17_p3 = scmp.ge.s32.totalorder %s873_s30, 4   ;;  %s997_s24 = smov %s793_s25 }
 0x450   : > { %s998_s25 = smov %s797_s26  ;;  %s999_s26 = smov %s884_s10 }
 0x451   : > { %s1000_s27 = smov %s873_s30  ;;  %19 = sbr.rel (!%p17_p3) target bundleno = 3 (0x3), region = 83 }
 0x458   :  { %601 = vsyncpa [#allocation5], 1 }
 0x459   :  { %603 = vsyncpa [#allocation5 + $0x1], 1 }

</bundles_post_ra>
